<compile_context>
chip_gen: v7x
topology: tpu7x:2x2x1
jax: 0.10.0
libtpu: 0.0.40
codegen_flags: <defaults>
</compile_context>

<pallas_src>
import functools

import jax
import jax.numpy as jnp
from jax import lax
from jax.experimental import pallas as pl
from jax.experimental.pallas import tpu as pltpu

NUM_FEAT = 1
HIDDEN = 10
NUM_LAYERS = 1
NUM_BATCH = 1
OUTPUT_SIZE = 1

SUB = 8                # timesteps per unrolled sub-block (one sublane tile of hs)
MAX_CHUNK = 128        # timesteps per grid iteration (lane width of the out chunk)
FULL_UNROLL_SUBS = 2   # chunks with <= 2 sub-blocks (<=16 steps) fully unrolled


def _rnn_chunk_kernel(x_smem, w_ih_ref, w_hh_ref, bias_ref, w_out_ref,
                      b_out_smem, out_ref, hn_ref, h_carry, hs_scratch,
                      *, seq, seq_pad):
    """One seq-chunk of the ReLU-RNN recurrence + the chunk's output Linear.

    x_smem     : (seq_pad,)        full input sequence, SMEM (scalar reads)
    w_ih_ref   : (1, HIDDEN)       W_ih^T
    w_hh_ref   : (HIDDEN, HIDDEN)  W_hh^T
    bias_ref   : (1, HIDDEN)       b_ih + b_hh
    w_out_ref  : (1, HIDDEN)       W_out (row)
    b_out_smem : (1,)              b_out, SMEM scalar
    out_ref    : (1, chunk)        lane-dense output chunk
    hn_ref     : (1, HIDDEN)       final hidden state (same block every chunk)
    h_carry    : (1, HIDDEN) VMEM  persistent h across grid iterations
    hs_scratch : (chunk, HIDDEN)   per-chunk h_t staging
    """
    chunk = hs_scratch.shape[0]
    n_sub = chunk // SUB
    ci = pl.program_id(0)
    base = ci * chunk
    masked = seq_pad != seq          # static: only emit tail masking if padded

    @pl.when(ci == 0)
    def _():
        h_carry[...] = jnp.zeros_like(h_carry)

    # Weights loaded once; vreg/VMEM resident for the whole chunk.
    w_ih = w_ih_ref[...]             # (1, HIDDEN)
    w_hh = w_hh_ref[...]             # (HIDDEN, HIDDEN)
    bias = bias_ref[...]             # (1, HIDDEN)

    def step(g, h):
        # Scalar-broadcast input projection (VPU, off the MXU latency chain).
        pre = x_smem[g] * w_ih + bias
        h_new = jnp.maximum(
            pre + jnp.dot(h, w_hh, preferred_element_type=jnp.float32), 0.0)
        if masked:
            # Padded tail steps keep h unchanged (so hn stays correct).
            h_new = jnp.where(g < seq, h_new, h)
        return h_new

    def sub_body(blk, h):
        row0 = blk * SUB
        if not isinstance(row0, int):
            row0 = pl.multiple_of(row0, SUB)
        rows = []
        for s in range(SUB):                     # static 8-step unroll
            h = step(base + row0 + s, h)
            rows.append(h)
        # Assemble an (8, HIDDEN) tile and store it aligned (unmasked tile vst).
        hs_scratch[pl.ds(row0, SUB), :] = jnp.concatenate(rows, axis=0)
        return h

    h = h_carry[...]
    if n_sub <= FULL_UNROLL_SUBS:
        for blk in range(n_sub):                 # short chunk: full unroll
            h = sub_body(blk, h)
    else:
        h = lax.fori_loop(0, n_sub, sub_body, h)  # 8-wide body per iteration

    h_carry[...] = h
    hn_ref[...] = h                              # same block each chunk; last wins

    # Hoisted, lane-dense output Linear for the whole chunk:
    # (1, HIDDEN) x (chunk, HIDDEN)^T -> (1, chunk); single unmasked store.
    out_row = lax.dot_general(
        w_out_ref[...], hs_scratch[...],
        dimension_numbers=(((1,), (1,)), ((), ())),
        preferred_element_type=jnp.float32)
    out_ref[...] = out_row + b_out_smem[0]


@jax.jit
def simple_rnn_forward(inputs, params):
    """inputs: (seq, 1, 1) float32 -> (out (seq,1,1), hn (1,1,HIDDEN))."""
    seq = inputs.shape[0]
    seq8 = ((seq + SUB - 1) // SUB) * SUB
    chunk = min(MAX_CHUNK, seq8)
    n_chunks = (seq + chunk - 1) // chunk
    seq_pad = n_chunks * chunk

    x = inputs.reshape(seq).astype(jnp.float32)
    x = jnp.pad(x, (0, seq_pad - seq))                          # (seq_pad,)

    w_ih_t = params["w_ih"].T.reshape(NUM_FEAT, HIDDEN)          # (1, HIDDEN)
    w_hh_t = params["w_hh"].T                                    # (HIDDEN, HIDDEN)
    bias = (params["b_ih"] + params["b_hh"]).reshape(1, HIDDEN)  # b_ih + b_hh
    w_out = params["w_out"].reshape(OUTPUT_SIZE, HIDDEN)         # (1, HIDDEN)
    b_out = params["b_out"].reshape(OUTPUT_SIZE)                 # (1,)

    kernel = functools.partial(_rnn_chunk_kernel, seq=seq, seq_pad=seq_pad)
    smem_spec = pl.BlockSpec(memory_space=pltpu.MemorySpace.SMEM)

    grid_spec = pltpu.PrefetchScalarGridSpec(
        num_scalar_prefetch=0,
        grid=(n_chunks,),
        in_specs=[
            smem_spec,                                           # x (SMEM)
            pl.BlockSpec((1, HIDDEN), lambda i: (0, 0)),         # W_ih^T
            pl.BlockSpec((HIDDEN, HIDDEN), lambda i: (0, 0)),    # W_hh^T
            pl.BlockSpec((1, HIDDEN), lambda i: (0, 0)),         # bias
            pl.BlockSpec((1, HIDDEN), lambda i: (0, 0)),         # W_out
            smem_spec,                                           # b_out (SMEM)
        ],
        out_specs=(
            pl.BlockSpec((1, chunk), lambda i: (0, i)),          # out (lane-dense)
            pl.BlockSpec((1, HIDDEN), lambda i: (0, 0)),         # hn
        ),
        scratch_shapes=[
            pltpu.VMEM((1, HIDDEN), jnp.float32),                # persistent h
            pltpu.VMEM((chunk, HIDDEN), jnp.float32),            # hs chunk staging
        ],
    )

    out_lane, hn2d = pl.pallas_call(
        kernel,
        grid_spec=grid_spec,
        out_shape=(
            jax.ShapeDtypeStruct((1, seq_pad), jnp.float32),
            jax.ShapeDtypeStruct((1, HIDDEN), jnp.float32),
        ),
        compiler_params=pltpu.CompilerParams(
            dimension_semantics=("arbitrary",)),
    )(x, w_ih_t, w_hh_t, bias, w_out, b_out)

    out = out_lane[0, :seq].reshape(seq, NUM_BATCH, OUTPUT_SIZE)
    hn = hn2d.reshape(NUM_LAYERS, NUM_BATCH, HIDDEN)
    return out, hn


def ref_forward(inputs, params):
    """Pure-JAX reference matching torch.nn.RNN(relu) + Linear semantics."""
    def step(h, x_t):                                  # x_t: (1,1), h: (1,HIDDEN)
        pre = (x_t @ params["w_ih"].T + h @ params["w_hh"].T
               + params["b_ih"] + params["b_hh"])
        h_new = jnp.maximum(pre, 0.0)
        return h_new, h_new

    h0 = jnp.zeros((NUM_BATCH, HIDDEN), jnp.float32)
    hn, hs = lax.scan(step, h0, inputs)                # hs: (seq, 1, HIDDEN)
    out = hs @ params["w_out"].T + params["b_out"]     # (seq, 1, 1)
    return out, hn[None]


def init_params(key):
    """Deterministic init mimicking PyTorch's U(-1/sqrt(hidden), 1/sqrt(hidden))."""
    k = 1.0 / jnp.sqrt(jnp.float32(HIDDEN))
    keys = jax.random.split(key, 6)
    u = lambda kk, shape: jax.random.uniform(kk, shape, jnp.float32, -k, k)
    return {
        "w_ih": u(keys[0], (HIDDEN, NUM_FEAT)),
        "w_hh": u(keys[1], (HIDDEN, HIDDEN)),
        "b_ih": u(keys[2], (HIDDEN,)),
        "b_hh": u(keys[3], (HIDDEN,)),
        "w_out": u(keys[4], (OUTPUT_SIZE, HIDDEN)),
        "b_out": u(keys[5], (OUTPUT_SIZE,)),
    }


if __name__ == "__main__":
    key = jax.random.PRNGKey(0)
    pkey, xkey = jax.random.split(key)
    params = init_params(pkey)

    seq_len = 8
    inputs = jax.random.normal(xkey, (seq_len, NUM_BATCH, NUM_FEAT), jnp.float32)

    out, hn = simple_rnn_forward(inputs, params)
    out, hn = jax.block_until_ready((out, hn))

    out_ref, hn_ref = ref_forward(inputs, params)
    assert out.shape == (seq_len, NUM_BATCH, OUTPUT_SIZE)
    assert hn.shape == (NUM_LAYERS, NUM_BATCH, HIDDEN)
    assert jnp.allclose(out, out_ref, atol=1e-5, rtol=1e-5)
    assert jnp.allclose(hn, hn_ref, atol=1e-5, rtol=1e-5)

    print("KERNEL_OK")
</pallas_src>

<mosaic_0001>
module attributes {stable_mosaic.version = 11 : i64} {
  func.func @_rnn_chunk_kernel(%arg0: i32, %arg1: memref<8xf32, #tpu.memory_space<smem>>, %arg2: memref<1x10xf32, #tpu.memory_space<vmem>>, %arg3: memref<10x10xf32, #tpu.memory_space<vmem>>, %arg4: memref<1x10xf32, #tpu.memory_space<vmem>>, %arg5: memref<1x10xf32, #tpu.memory_space<vmem>>, %arg6: memref<1xf32, #tpu.memory_space<smem>>, %arg7: memref<1x8xf32, #tpu.memory_space<vmem>>, %arg8: memref<1x10xf32, #tpu.memory_space<vmem>>, %arg9: memref<1x10xf32, #tpu.memory_space<vmem>>, %arg10: memref<8x10xf32, #tpu.memory_space<vmem>>) attributes {dimension_semantics = [#tpu.dimension_semantics<arbitrary>], iteration_bounds = array<i64: 1>, scalar_prefetch = 0 : i64, scratch_operands = 2 : i64, tpu.core_type = #tpu.core_type<tc>, window_params = [{transform_indices = @transform_0, window_bounds = array<i64: 8>}, {pipeline_mode = #tpu.pipeline_mode<synchronous>, transform_indices = @transform_1, window_bounds = array<i64: 1, 10>}, {pipeline_mode = #tpu.pipeline_mode<synchronous>, transform_indices = @transform_2, window_bounds = array<i64: 10, 10>}, {pipeline_mode = #tpu.pipeline_mode<synchronous>, transform_indices = @transform_3, window_bounds = array<i64: 1, 10>}, {pipeline_mode = #tpu.pipeline_mode<synchronous>, transform_indices = @transform_4, window_bounds = array<i64: 1, 10>}, {transform_indices = @transform_5, window_bounds = array<i64: 1>}, {transform_indices = @transform_6, window_bounds = array<i64: 1, 8>}, {pipeline_mode = #tpu.pipeline_mode<synchronous>, transform_indices = @transform_7, window_bounds = array<i64: 1, 10>}]} {
    %c8_i32 = arith.constant 8 : i32
    %0 = arith.muli %arg0, %c8_i32 : i32
    %c0_i32 = arith.constant 0 : i32
    %1 = arith.cmpi eq, %arg0, %c0_i32 : i32
    %2 = arith.extui %1 : i1 to i32
    %c0_i32_0 = arith.constant 0 : i32
    %3 = arith.cmpi ne, %2, %c0_i32_0 : i32
    scf.if %3 {
      %cst_46 = arith.constant 0.000000e+00 : f32
      %107 = vector.broadcast %cst_46 : f32 to vector<1x10xf32>
      %c0_47 = arith.constant 0 : index
      %c0_48 = arith.constant 0 : index
      %108 = vector.load %arg9[%c0_47, %c0_48] : memref<1x10xf32, #tpu.memory_space<vmem>>, vector<1x10xf32>
      tpu.vector_store %arg9[%c0_47, %c0_48], %107 {strides = array<i32>} : memref<1x10xf32, #tpu.memory_space<vmem>>, vector<1x10xf32>,
    } else {
    }
    %c0 = arith.constant 0 : index
    %c0_1 = arith.constant 0 : index
    %4 = vector.load %arg2[%c0, %c0_1] : memref<1x10xf32, #tpu.memory_space<vmem>>, vector<1x10xf32>
    %c0_2 = arith.constant 0 : index
    %c0_3 = arith.constant 0 : index
    %5 = vector.load %arg3[%c0_2, %c0_3] : memref<10x10xf32, #tpu.memory_space<vmem>>, vector<10x10xf32>
    %c0_4 = arith.constant 0 : index
    %c0_5 = arith.constant 0 : index
    %6 = vector.load %arg4[%c0_4, %c0_5] : memref<1x10xf32, #tpu.memory_space<vmem>>, vector<1x10xf32>
    %c0_6 = arith.constant 0 : index
    %c0_7 = arith.constant 0 : index
    %7 = vector.load %arg9[%c0_6, %c0_7] : memref<1x10xf32, #tpu.memory_space<vmem>>, vector<1x10xf32>
    %c0_i32_8 = arith.constant 0 : i32
    %8 = arith.addi %0, %c0_i32_8 : i32
    %c0_i32_9 = arith.constant 0 : i32
    %9 = arith.addi %8, %c0_i32_9 : i32
    %10 = arith.index_cast %9 : i32 to index
    %11 = memref.load %arg1[%10] : memref<8xf32, #tpu.memory_space<smem>>
    %12 = vector.broadcast %11 : f32 to vector<1x10xf32>
    %13 = arith.mulf %12, %4 : vector<1x10xf32>
    %14 = arith.addf %13, %6 : vector<1x10xf32>
    %cst = arith.constant dense<0.000000e+00> : vector<1x10xf32>
    %15 = tpu.matmul %7, %5, %cst {dimension_numbers = #tpu.dot_dimension_numbers<[1], [0], [0], [1], [0, 0, 1, 1], [], []>} : vector<1x10xf32>, vector<10x10xf32>, vector<1x10xf32> -> vector<1x10xf32>
    %16 = arith.addf %14, %15 : vector<1x10xf32>
    %cst_10 = arith.constant 0.000000e+00 : f32
    %17 = vector.broadcast %cst_10 : f32 to vector<1x10xf32>
    %18 = arith.maximumf %16, %17 : vector<1x10xf32>
    %c0_i32_11 = arith.constant 0 : i32
    %19 = arith.addi %0, %c0_i32_11 : i32
    %c1_i32 = arith.constant 1 : i32
    %20 = arith.addi %19, %c1_i32 : i32
    %21 = arith.index_cast %20 : i32 to index
    %22 = memref.load %arg1[%21] : memref<8xf32, #tpu.memory_space<smem>>
    %23 = vector.broadcast %22 : f32 to vector<1x10xf32>
    %24 = arith.mulf %23, %4 : vector<1x10xf32>
    %25 = arith.addf %24, %6 : vector<1x10xf32>
    %cst_12 = arith.constant dense<0.000000e+00> : vector<1x10xf32>
    %26 = tpu.matmul %18, %5, %cst_12 {dimension_numbers = #tpu.dot_dimension_numbers<[1], [0], [0], [1], [0, 0, 1, 1], [], []>} : vector<1x10xf32>, vector<10x10xf32>, vector<1x10xf32> -> vector<1x10xf32>
    %27 = arith.addf %25, %26 : vector<1x10xf32>
    %cst_13 = arith.constant 0.000000e+00 : f32
    %28 = vector.broadcast %cst_13 : f32 to vector<1x10xf32>
    %29 = arith.maximumf %27, %28 : vector<1x10xf32>
    %c0_i32_14 = arith.constant 0 : i32
    %30 = arith.addi %0, %c0_i32_14 : i32
    %c2_i32 = arith.constant 2 : i32
    %31 = arith.addi %30, %c2_i32 : i32
    %32 = arith.index_cast %31 : i32 to index
    %33 = memref.load %arg1[%32] : memref<8xf32, #tpu.memory_space<smem>>
    %34 = vector.broadcast %33 : f32 to vector<1x10xf32>
    %35 = arith.mulf %34, %4 : vector<1x10xf32>
    %36 = arith.addf %35, %6 : vector<1x10xf32>
    %cst_15 = arith.constant dense<0.000000e+00> : vector<1x10xf32>
    %37 = tpu.matmul %29, %5, %cst_15 {dimension_numbers = #tpu.dot_dimension_numbers<[1], [0], [0], [1], [0, 0, 1, 1], [], []>} : vector<1x10xf32>, vector<10x10xf32>, vector<1x10xf32> -> vector<1x10xf32>
    %38 = arith.addf %36, %37 : vector<1x10xf32>
    %cst_16 = arith.constant 0.000000e+00 : f32
    %39 = vector.broadcast %cst_16 : f32 to vector<1x10xf32>
    %40 = arith.maximumf %38, %39 : vector<1x10xf32>
    %c0_i32_17 = arith.constant 0 : i32
    %41 = arith.addi %0, %c0_i32_17 : i32
    %c3_i32 = arith.constant 3 : i32
    %42 = arith.addi %41, %c3_i32 : i32
    %43 = arith.index_cast %42 : i32 to index
    %44 = memref.load %arg1[%43] : memref<8xf32, #tpu.memory_space<smem>>
    %45 = vector.broadcast %44 : f32 to vector<1x10xf32>
    %46 = arith.mulf %45, %4 : vector<1x10xf32>
    %47 = arith.addf %46, %6 : vector<1x10xf32>
    %cst_18 = arith.constant dense<0.000000e+00> : vector<1x10xf32>
    %48 = tpu.matmul %40, %5, %cst_18 {dimension_numbers = #tpu.dot_dimension_numbers<[1], [0], [0], [1], [0, 0, 1, 1], [], []>} : vector<1x10xf32>, vector<10x10xf32>, vector<1x10xf32> -> vector<1x10xf32>
    %49 = arith.addf %47, %48 : vector<1x10xf32>
    %cst_19 = arith.constant 0.000000e+00 : f32
    %50 = vector.broadcast %cst_19 : f32 to vector<1x10xf32>
    %51 = arith.maximumf %49, %50 : vector<1x10xf32>
    %c0_i32_20 = arith.constant 0 : i32
    %52 = arith.addi %0, %c0_i32_20 : i32
    %c4_i32 = arith.constant 4 : i32
    %53 = arith.addi %52, %c4_i32 : i32
    %54 = arith.index_cast %53 : i32 to index
    %55 = memref.load %arg1[%54] : memref<8xf32, #tpu.memory_space<smem>>
    %56 = vector.broadcast %55 : f32 to vector<1x10xf32>
    %57 = arith.mulf %56, %4 : vector<1x10xf32>
    %58 = arith.addf %57, %6 : vector<1x10xf32>
    %cst_21 = arith.constant dense<0.000000e+00> : vector<1x10xf32>
    %59 = tpu.matmul %51, %5, %cst_21 {dimension_numbers = #tpu.dot_dimension_numbers<[1], [0], [0], [1], [0, 0, 1, 1], [], []>} : vector<1x10xf32>, vector<10x10xf32>, vector<1x10xf32> -> vector<1x10xf32>
    %60 = arith.addf %58, %59 : vector<1x10xf32>
    %cst_22 = arith.constant 0.000000e+00 : f32
    %61 = vector.broadcast %cst_22 : f32 to vector<1x10xf32>
    %62 = arith.maximumf %60, %61 : vector<1x10xf32>
    %c0_i32_23 = arith.constant 0 : i32
    %63 = arith.addi %0, %c0_i32_23 : i32
    %c5_i32 = arith.constant 5 : i32
    %64 = arith.addi %63, %c5_i32 : i32
    %65 = arith.index_cast %64 : i32 to index
    %66 = memref.load %arg1[%65] : memref<8xf32, #tpu.memory_space<smem>>
    %67 = vector.broadcast %66 : f32 to vector<1x10xf32>
    %68 = arith.mulf %67, %4 : vector<1x10xf32>
    %69 = arith.addf %68, %6 : vector<1x10xf32>
    %cst_24 = arith.constant dense<0.000000e+00> : vector<1x10xf32>
    %70 = tpu.matmul %62, %5, %cst_24 {dimension_numbers = #tpu.dot_dimension_numbers<[1], [0], [0], [1], [0, 0, 1, 1], [], []>} : vector<1x10xf32>, vector<10x10xf32>, vector<1x10xf32> -> vector<1x10xf32>
    %71 = arith.addf %69, %70 : vector<1x10xf32>
    %cst_25 = arith.constant 0.000000e+00 : f32
    %72 = vector.broadcast %cst_25 : f32 to vector<1x10xf32>
    %73 = arith.maximumf %71, %72 : vector<1x10xf32>
    %c0_i32_26 = arith.constant 0 : i32
    %74 = arith.addi %0, %c0_i32_26 : i32
    %c6_i32 = arith.constant 6 : i32
    %75 = arith.addi %74, %c6_i32 : i32
    %76 = arith.index_cast %75 : i32 to index
    %77 = memref.load %arg1[%76] : memref<8xf32, #tpu.memory_space<smem>>
    %78 = vector.broadcast %77 : f32 to vector<1x10xf32>
    %79 = arith.mulf %78, %4 : vector<1x10xf32>
    %80 = arith.addf %79, %6 : vector<1x10xf32>
    %cst_27 = arith.constant dense<0.000000e+00> : vector<1x10xf32>
    %81 = tpu.matmul %73, %5, %cst_27 {dimension_numbers = #tpu.dot_dimension_numbers<[1], [0], [0], [1], [0, 0, 1, 1], [], []>} : vector<1x10xf32>, vector<10x10xf32>, vector<1x10xf32> -> vector<1x10xf32>
    %82 = arith.addf %80, %81 : vector<1x10xf32>
    %cst_28 = arith.constant 0.000000e+00 : f32
    %83 = vector.broadcast %cst_28 : f32 to vector<1x10xf32>
    %84 = arith.maximumf %82, %83 : vector<1x10xf32>
    %c0_i32_29 = arith.constant 0 : i32
    %85 = arith.addi %0, %c0_i32_29 : i32
    %c7_i32 = arith.constant 7 : i32
    %86 = arith.addi %85, %c7_i32 : i32
    %87 = arith.index_cast %86 : i32 to index
    %88 = memref.load %arg1[%87] : memref<8xf32, #tpu.memory_space<smem>>
    %89 = vector.broadcast %88 : f32 to vector<1x10xf32>
    %90 = arith.mulf %89, %4 : vector<1x10xf32>
    %91 = arith.addf %90, %6 : vector<1x10xf32>
    %cst_30 = arith.constant dense<0.000000e+00> : vector<1x10xf32>
    %92 = tpu.matmul %84, %5, %cst_30 {dimension_numbers = #tpu.dot_dimension_numbers<[1], [0], [0], [1], [0, 0, 1, 1], [], []>} : vector<1x10xf32>, vector<10x10xf32>, vector<1x10xf32> -> vector<1x10xf32>
    %93 = arith.addf %91, %92 : vector<1x10xf32>
    %cst_31 = arith.constant 0.000000e+00 : f32
    %94 = vector.broadcast %cst_31 : f32 to vector<1x10xf32>
    %95 = arith.maximumf %93, %94 : vector<1x10xf32>
    %96 = tpu.concatenate %18, %29, %40, %51, %62, %73, %84, %95 in 0 : vector<1x10xf32>, vector<1x10xf32>, vector<1x10xf32>, vector<1x10xf32>, vector<1x10xf32>, vector<1x10xf32>, vector<1x10xf32>, vector<1x10xf32> -> vector<8x10xf32>
    %c0_32 = arith.constant 0 : index
    %c0_33 = arith.constant 0 : index
    %97 = vector.load %arg10[%c0_32, %c0_33] : memref<8x10xf32, #tpu.memory_space<vmem>>, vector<8x10xf32>
    tpu.vector_store %arg10[%c0_32, %c0_33], %96 {strides = array<i32>} : memref<8x10xf32, #tpu.memory_space<vmem>>, vector<8x10xf32>,
    %c0_34 = arith.constant 0 : index
    %c0_35 = arith.constant 0 : index
    %98 = vector.load %arg9[%c0_34, %c0_35] : memref<1x10xf32, #tpu.memory_space<vmem>>, vector<1x10xf32>
    tpu.vector_store %arg9[%c0_34, %c0_35], %95 {strides = array<i32>} : memref<1x10xf32, #tpu.memory_space<vmem>>, vector<1x10xf32>,
    %c0_36 = arith.constant 0 : index
    %c0_37 = arith.constant 0 : index
    %99 = vector.load %arg8[%c0_36, %c0_37] : memref<1x10xf32, #tpu.memory_space<vmem>>, vector<1x10xf32>
    tpu.vector_store %arg8[%c0_36, %c0_37], %95 {strides = array<i32>} : memref<1x10xf32, #tpu.memory_space<vmem>>, vector<1x10xf32>,
    %c0_38 = arith.constant 0 : index
    %c0_39 = arith.constant 0 : index
    %100 = vector.load %arg5[%c0_38, %c0_39] : memref<1x10xf32, #tpu.memory_space<vmem>>, vector<1x10xf32>
    %c0_40 = arith.constant 0 : index
    %c0_41 = arith.constant 0 : index
    %101 = vector.load %arg10[%c0_40, %c0_41] : memref<8x10xf32, #tpu.memory_space<vmem>>, vector<8x10xf32>
    %cst_42 = arith.constant dense<0.000000e+00> : vector<1x8xf32>
    %102 = tpu.matmul %100, %101, %cst_42 {dimension_numbers = #tpu.dot_dimension_numbers<[1], [1], [0], [0], [0, 0, 1, 0], [], []>} : vector<1x10xf32>, vector<8x10xf32>, vector<1x8xf32> -> vector<1x8xf32>
    %c0_43 = arith.constant 0 : index
    %103 = memref.load %arg6[%c0_43] : memref<1xf32, #tpu.memory_space<smem>>
    %104 = vector.broadcast %103 : f32 to vector<1x8xf32>
    %105 = arith.addf %102, %104 : vector<1x8xf32>
    %c0_44 = arith.constant 0 : index
    %c0_45 = arith.constant 0 : index
    %106 = vector.load %arg7[%c0_44, %c0_45] : memref<1x8xf32, #tpu.memory_space<vmem>>, vector<1x8xf32>
    tpu.vector_store %arg7[%c0_44, %c0_45], %105 {strides = array<i32>} : memref<1x8xf32, #tpu.memory_space<vmem>>, vector<1x8xf32>,
    return
  }
  func.func @transform_0(%arg0: i32) -> i32 {
    %c0_i32 = arith.constant 0 : i32
    %c0_i32_0 = arith.constant 0 : i32
    return %c0_i32 : i32
  }
  func.func @transform_1(%arg0: i32) -> (i32, i32) {
    %c0_i32 = arith.constant 0 : i32
    %c0_i32_0 = arith.constant 0 : i32
    %c0_i32_1 = arith.constant 0 : i32
    return %c0_i32, %c0_i32_0 : i32, i32
  }
  func.func @transform_2(%arg0: i32) -> (i32, i32) {
    %c0_i32 = arith.constant 0 : i32
    %c0_i32_0 = arith.constant 0 : i32
    %c0_i32_1 = arith.constant 0 : i32
    return %c0_i32, %c0_i32_0 : i32, i32
  }
  func.func @transform_3(%arg0: i32) -> (i32, i32) {
    %c0_i32 = arith.constant 0 : i32
    %c0_i32_0 = arith.constant 0 : i32
    %c0_i32_1 = arith.constant 0 : i32
    return %c0_i32, %c0_i32_0 : i32, i32
  }
  func.func @transform_4(%arg0: i32) -> (i32, i32) {
    %c0_i32 = arith.constant 0 : i32
    %c0_i32_0 = arith.constant 0 : i32
    %c0_i32_1 = arith.constant 0 : i32
    return %c0_i32, %c0_i32_0 : i32, i32
  }
  func.func @transform_5(%arg0: i32) -> i32 {
    %c0_i32 = arith.constant 0 : i32
    %c0_i32_0 = arith.constant 0 : i32
    return %c0_i32 : i32
  }
  func.func @transform_6(%arg0: i32) -> (i32, i32) {
    %c0_i32 = arith.constant 0 : i32
    %c0_i32_0 = arith.constant 0 : i32
    return %c0_i32, %arg0 : i32, i32
  }
  func.func @transform_7(%arg0: i32) -> (i32, i32) {
    %c0_i32 = arith.constant 0 : i32
    %c0_i32_0 = arith.constant 0 : i32
    %c0_i32_1 = arith.constant 0 : i32
    return %c0_i32, %c0_i32_0 : i32, i32
  }
}

</mosaic_0001>

<bundles_post_ra>
// kernel: simple_rnn_forward.1
= control target key start
LH: loop header
LB: loop body
LE: loop exit
PB: predicated region body
PF: predicated region fallthrough
CT: control target
= control target key end

     0   :  { %14 = vsyncpa [#allocation7], 0  ;;  %s1269_s0 = inlined_call_operand.vmem [shape: f32[8], index: 0, kind: input, shape index: {}]   ;;  %s1270_s1 = inlined_call_operand.vmem [shape: f32[1,10], index: 1, kind: input, shape index: {}]   ;;  %s1271_s2 = inlined_call_operand.vmem [shape: f32[10,10], index: 2, kind: input, shape index: {}]   ;;  %s1272_s3 = inlined_call_operand.vmem [shape: f32[1,10], index: 3, kind: input, shape index: {}]   ;;  %s1273_s4 = inlined_call_operand.vmem [shape: f32[1,10], index: 4, kind: input, shape index: {}]   ;;  %s1274_s5 = inlined_call_operand.<no memory space> [shape: f32[1], index: 5, kind: input, shape index: {}]   ;;  %s1275_s6 = inlined_call_operand.hbm [shape: f32[1,8], index: 6, kind: output, shape index: {0}]   ;;  %s1276_s7 = inlined_call_operand.hbm [shape: f32[1,10], index: 7, kind: output, shape index: {1}]  }
   0x1   :  { %15 = vsyncpa [#allocation6], 0 }
   0x2   :  { %16 = vsyncpa [#allocation10], 0  ;;  %s23_s26 = sshll.u32 %s1269_s0, 4  ;;  %s24_s26 = int_to_ptr.vmem [resolvable:$true] %s23_s26 }
   0x3   :  { %s1012_s27 = scalar_lea.vmem %s24_s26, 16  ;;  %p1017_p1 = scmp.lt.s32.totalorder %s24_s26, %s24_s26 }
   0x4   :  { %p1013_p0 = scmp.ne.s32.totalorder %s24_s26, %s1012_s27  ;;  %p1018_p2 = scmp.lt.s32.totalorder %s1012_s27, %s1012_s27 }
   0x6   :  { %p1019_p3 = por %p1018_p2, %p1017_p1 }
   0x8   :  { %p1020_p4 = pnand %p1019_p3, %p1013_p0 }
   0xa   :  { %1023 = shalt.err (!%p1020_p4)
}
   0xb   :  { %s1074_s28 = smov [#allocation5]  }
   0xc   :  { %26 = dma.vmem_to_smem %s24_s26, 16, %s1074_s28, [#allocation7]  }
   0xd   :  { %1068 = dma.done.wait [#allocation7], 16  }
   0xe   :  { %1069 = vsyncadd [#allocation7], 4294967280 }
   0xf   :  { %40 = sfence }
  0x10   :  { %v49_v0 = vld [vmem:[%s1271_s2] sm:$0xff]  ;;  %v50_v1 = vld [vmem:[%s1271_s2 + $0x8] sm:$0x3]  ;;  %vm61_vm0 = vcmask 1041408   ;;  %v1075_v2 = vmov 0.0|0.0   ;;  %vm1076_vm1 = vmmov 1   ;;  %v697_v23 = vlaneseq }
  0x11   :  { %973 = vmatprep.subr.bf16.mxu0 %v1075_v2  ;;  %v1131_v3 = vpack.c.bf16 %v50_v1, %v49_v0  ;;  %vm1134_vm2 = vmpackc.low %vm61_vm0, %vm1076_vm1  ;;  %vm46_vm3 = vcmask 73728   ;;  %977 = vmatprep.subr.bf16.mxu1 %v1075_v2  ;;  %vm1077_vm4 = vmmov 0   ;;  %v1078_v5 = vmov 0.0   ;;  %s53_s0 = sld [smem:[#allocation5]]  ;;  %v1163_v7 = vld [vmem:[%s1270_s1] sm:$0x1] }
  0x12   :  { %916 = vmatprep.mubr.msk.f32.mxu0 %vm1077_vm4, %v1078_v5  ;;  %47 = vst.msk [vmem:[#allocation2] sm:$0x1] %vm46_vm3, %v1078_v5  ;;  %923 = vmatprep.mubr.msk.f32.mxu1 %vm1077_vm4, %v1078_v5  ;;  %vm57_vm5 = vcmask 80896   ;;  %v1169_v10 = vld [vmem:[%s1272_s3] sm:$0x1]  ;;  %s863_s1 = sld [smem:[#allocation5 + $0x1]] }
  0x13   :  { %976 = vmatpush3.bf16.msk.msra.mxu0 %vm1134_vm2, %v1131_v3  ;;  %980 = vmatpush3.bf16.msk.msra.mxu1 %vm1134_vm2, %v1131_v3  ;;  %s866_s3 = sld [smem:[#allocation5 + $0x2]]  ;;  %v698_v26 = vshrl.u32 %v697_v23, 7  ;;  %vm733_vm6 = vcmask 1040384   ;;  %s869_s13 = sld [smem:[#allocation5 + $0x3]]  ;;  %vm736_vm7 = vcmask 1042432   ;;  %vm738_vm8 = vcmask 1043456  }
  0x14   :  { %981 = vmatprep.subr.bf16.mxu0 %v1075_v2  ;;  %985 = vmatprep.subr.bf16.mxu1 %v1075_v2  ;;  %s872_s14 = sld [smem:[#allocation5 + $0x4]]  ;;  %s875_s15 = sld [smem:[#allocation5 + $0x5]]  ;;  %vm740_vm9 = vcmask 1044480   ;;  %vm742_vm10 = vcmask 1045504   ;;  %vm744_vm11 = vcmask 1046528  }
  0x15   :  { %v1190_v28 = vsub.s32 0, %v698_v26  ;;  %s878_s16 = sld [smem:[#allocation5 + $0x6]]  ;;  %s881_s17 = sld [smem:[#allocation5 + $0x7]] }
  0x16   :  { %s1079_s20 = smov [#allocation9]  }
  0x17   :  { %v54_v8 = vstv %s53_s0  ;;  %s848_s21 = sshll.u32 %s1079_s20, 4  ;;  %s849_s21 = int_to_ptr.vmem [resolvable:$true] %s848_s21 }
  0x18   :  { %v55_v9 = vmul.f32 %v54_v8, %v1163_v7  ;;  %v139_v16 = vstv %s863_s1  ;;  %s1024_s22 = scalar_lea.vmem %s849_s21, 16  ;;  %s1028_s23 = scalar_lea.vmem %s849_s21, 32 }
  0x19   :  { %v52_v6 = vld [vmem:[#allocation2] sm:$0x1]  ;;  %v140_v17 = vmul.f32 %v139_v16, %v1163_v7  ;;  %v219_v24 = vstv %s866_s3  ;;  %v299_v37 = vstv %s869_s13  ;;  %p1025_p5 = scmp.ne.s32.totalorder %s849_s21, %s1024_s22  ;;  %p1029_p6 = scmp.lt.s32.totalorder %s849_s21, %s849_s21 }
  0x1a   :  { %917 = vmatmul.mubr.msk.f32.vlgmr.msra.gmra.mrb[0].mxu0 %vm57_vm5, %v52_v6  ;;  %v56_v11 = vadd.f32 %v55_v9, %v1169_v10  ;;  %v220_v25 = vmul.f32 %v219_v24, %v1163_v7  ;;  %v300_v38 = vmul.f32 %v299_v37, %v1163_v7  ;;  %v379_v46 = vstv %s872_s14  ;;  %p1030_p7 = scmp.lt.s32.totalorder %s1028_s23, %s1024_s22 }
  0x1b   :  { %984 = vmatpush3.bf16.msk.msra.mxu0 %vm1134_vm2, %v1131_v3  ;;  %930 = vmatprep.mubr.msk.f32.mxu0 %vm1077_vm4, %v1078_v5  ;;  %v141_v18 = vadd.f32 %v140_v17, %v1169_v10  ;;  %v380_v47 = vmul.f32 %v379_v46, %v1163_v7  ;;  %v459_v55 = vstv %s875_s15  ;;  %v539_v0 = vstv %s878_s16 }
  0x1c   :  { %989 = vmatprep.subr.bf16.mxu0 %v1075_v2  ;;  %v221_v27 = vadd.f32 %v220_v25, %v1169_v10  ;;  %v301_v39 = vadd.f32 %v300_v38, %v1169_v10  ;;  %v460_v56 = vmul.f32 %v459_v55, %v1163_v7  ;;  %v540_v1 = vmul.f32 %v539_v0, %v1163_v7  ;;  %p1031_p8 = por %p1030_p7, %p1029_p6 }
  0x1d   :  { %v381_v48 = vadd.f32 %v380_v47, %v1169_v10 }
  0x1e   :  { %v461_v57 = vadd.f32 %v460_v56, %v1169_v10  ;;  %p1032_p9 = pnand %p1031_p8, %p1025_p5 }
  0xed   :  { %v131_v12 = vpop.f32.mrb[0].mxu0 }
  0xee   :  { %v135_v13 = vadd.f32 %v131_v12, %v56_v11  ;;  %v918_v14 = vpop.f32.mrb[1].mxu0  ;;  %v619_v12 = vstv %s881_s17 }
  0xf0   :  { %v136_v15 = vmax.f32 %v135_v13, 0.0 }
  0xf2   :  { %924 = vmatmul.mubr.msk.f32.vlgmr.msra.gmra.mrb[0].mxu1 %vm57_vm5, %v136_v15 }
  0xf3   :  { %988 = vmatpush3.bf16.msk.msra.mxu1 %vm1134_vm2, %v1131_v3  ;;  %937 = vmatprep.mubr.msk.f32.mxu1 %vm1077_vm4, %v1078_v5 }
  0xf4   :  { %993 = vmatprep.subr.bf16.mxu1 %v1075_v2 }
 0x1c5   :  { %v211_v19 = vpop.f32.mrb[0].mxu1 }
 0x1c6   :  { %v215_v20 = vadd.f32 %v211_v19, %v141_v18  ;;  %v925_v21 = vpop.f32.mrb[1].mxu1 }
 0x1c8   :  { %v216_v22 = vmax.f32 %v215_v20, 0.0 }
 0x1ca   :  { %931 = vmatmul.mubr.msk.f32.vlgmr.msra.gmra.mrb[2].mxu0 %vm57_vm5, %v216_v22  ;;  %v700_v32 = vrot.slane %v216_v22, %v1190_v28 }
 0x1cb   :  { %992 = vmatpush3.bf16.msk.msra.mxu0 %vm1134_vm2, %v1131_v3  ;;  %944 = vmatprep.mubr.msk.f32.mxu0 %vm1077_vm4, %v1078_v5 }
 0x1cc   :  { %997 = vmatprep.subr.bf16.mxu0 %v1075_v2  ;;  %v734_v35 = vsel %vm733_vm6, %v136_v15, %v700_v32 }
 0x29d   :  { %v291_v29 = vpop.f32.mrb[2].mxu0 }
 0x29e   :  { %v295_v30 = vadd.f32 %v291_v29, %v221_v27  ;;  %v932_v31 = vpop.f32.mrb[3].mxu0 }
 0x2a0   :  { %v296_v33 = vmax.f32 %v295_v30, 0.0 }
 0x2a2   :  { %v705_v34 = vrot.slane %v296_v33, %v1190_v28  ;;  %938 = vmatmul.mubr.msk.f32.vlgmr.msra.gmra.mrb[2].mxu1 %vm57_vm5, %v296_v33 }
 0x2a3   :  { %996 = vmatpush3.bf16.msk.msra.mxu1 %vm1134_vm2, %v1131_v3  ;;  %951 = vmatprep.mubr.msk.f32.mxu1 %vm1077_vm4, %v1078_v5 }
 0x2a4   :  { %v735_v36 = vsel %vm61_vm0, %v734_v35, %v705_v34  ;;  %1001 = vmatprep.subr.bf16.mxu1 %v1075_v2  ;;  %v541_v2 = vadd.f32 %v540_v1, %v1169_v10 }
 0x375   :  { %v371_v40 = vpop.f32.mrb[2].mxu1 }
 0x376   :  { %v375_v41 = vadd.f32 %v371_v40, %v301_v39  ;;  %v939_v42 = vpop.f32.mrb[3].mxu1 }
 0x378   :  { %v376_v43 = vmax.f32 %v375_v41, 0.0 }
 0x37a   :  { %v710_v44 = vrot.slane %v376_v43, %v1190_v28  ;;  %945 = vmatmul.mubr.msk.f32.vlgmr.msra.gmra.mrb[4].mxu0 %vm57_vm5, %v376_v43 }
 0x37b   :  { %1000 = vmatpush3.bf16.msk.msra.mxu0 %vm1134_vm2, %v1131_v3  ;;  %958 = vmatprep.mubr.msk.f32.mxu0 %vm1077_vm4, %v1078_v5 }
 0x37c   :  { %v737_v45 = vsel %vm736_vm7, %v735_v36, %v710_v44  ;;  %968 = vmatprep.subr.mxu0 %v1078_v5 }
 0x44d   :  { %v451_v49 = vpop.f32.mrb[4].mxu0 }
 0x44e   :  { %v455_v50 = vadd.f32 %v451_v49, %v381_v48  ;;  %v946_v51 = vpop.f32.mrb[5].mxu0 }
 0x450   :  { %v456_v52 = vmax.f32 %v455_v50, 0.0 }
 0x452   :  { %v715_v53 = vrot.slane %v456_v52, %v1190_v28  ;;  %952 = vmatmul.mubr.msk.f32.vlgmr.msra.gmra.mrb[4].mxu1 %vm57_vm5, %v456_v52 }
 0x453   :  { %1004 = vmatpush3.bf16.msk.msra.mxu1 %vm1134_vm2, %v1131_v3  ;;  %965 = vmatprep.mubr.msk.f32.mxu1 %vm1077_vm4, %v1078_v5 }
 0x454   :  { %v739_v54 = vsel %vm738_vm8, %v737_v45, %v715_v53 }
 0x525   :  { %v531_v58 = vpop.f32.mrb[4].mxu1 }
 0x526   :  { %v535_v59 = vadd.f32 %v531_v58, %v461_v57  ;;  %v953_v60 = vpop.f32.mrb[5].mxu1 }
 0x528   :  { %v536_v61 = vmax.f32 %v535_v59, 0.0 }
 0x52a   :  { %v720_v62 = vrot.slane %v536_v61, %v1190_v28  ;;  %959 = vmatmul.mubr.msk.f32.vlgmr.msra.gmra.mrb[6].mxu0 %vm57_vm5, %v536_v61 }
 0x52b   :  { %970 = vmatprep.mubr.msk.f32.mxu0 %vm1077_vm4, %v1078_v5  ;;  %v620_v5 = vmul.f32 %v619_v12, %v1163_v7  ;;  %v750_v7 = vld [vmem:[%s1273_s4] sm:$0x1] }
 0x52c   :  { %v741_v63 = vsel %vm740_vm9, %v739_v54, %v720_v62 }
 0x52d   :  { %v621_v13 = vadd.f32 %v620_v5, %v1169_v10 }
 0x5fd   :  { %v611_v3 = vpop.f32.mrb[6].mxu0 }
 0x5fe   :  { %v615_v4 = vadd.f32 %v611_v3, %v541_v2  ;;  %v960_v6 = vpop.f32.mrb[7].mxu0 }
 0x600   :  { %v616_v8 = vmax.f32 %v615_v4, 0.0 }
 0x602   :  { %v725_v9 = vrot.slane %v616_v8, %v1190_v28  ;;  %966 = vmatmul.mubr.msk.f32.vlgmr.msra.gmra.mrb[6].mxu1 %vm57_vm5, %v616_v8 }
 0x604   :  { %v743_v11 = vsel %vm742_vm10, %v741_v63, %v725_v9 }
 0x6d5   :  { %v691_v14 = vpop.f32.mrb[6].mxu1 }
 0x6d6   :  { %v695_v15 = vadd.f32 %v691_v14, %v621_v13  ;;  %v967_v16 = vpop.f32.mrb[7].mxu1 }
 0x6d8   :  { %v696_v17 = vmax.f32 %v695_v15, 0.0 }
 0x6da   :  { %v731_v18 = vrot.slane %v696_v17, %v1190_v28  ;;  %748 = vst.msk [vmem:[#allocation2] sm:$0x1] %vm46_vm3, %v696_v17  ;;  %749 = vst.msk [vmem:[#allocation9] sm:$0x1] %vm46_vm3, %v696_v17 }
 0x6dc   :  { %v745_v19 = vsel %vm744_vm11, %v743_v11, %v731_v18 }
 0x6dd   :  { %746 = vst.msk [vmem:[#allocation3] sm:$0xff] %vm57_vm5, %v745_v19 }
 0x6e4   :  { %v751_v20 = vld [vmem:[#allocation3] sm:$0xff] }
 0x6e5   :  { %969 = vmatpush3.xpose.msk.msra.mxu0 %vm57_vm5, %v751_v20 }
 0x6e8   :  { %971 = vmatmul.mubr.msk.f32.vlgmr.msra.gmra.mrb[8].mxu0 %vm57_vm5, %v750_v7 }
 0x6e9   :  { %1035 = shalt.err (!%p1032_p9)
}
 0x6ea   :  { %s1036_s26 = scalar_lea.hbm %s1276_s7, 16 }
 0x6eb   :  { %p1037_p10 = scmp.ne.s32.totalorder %s1276_s7, %s1036_s26  ;;  %p1040_p11 = scmp.lt.u32.totalorder %s1036_s26, %s1276_s7 }
 0x6ed   :  { %p1042_p12 = pnand %p1040_p11, %p1037_p10 }
 0x6ef   :  { %1045 = shalt.err (!%p1042_p12)
}
 0x6f0   :  { %851 = dma.vmem_to_hbm [thread:$0]  %s849_s21, 16, %s1276_s7, [#allocation10]   ;;  %v753_v10 = vstv %s1274_s5  ;;  %vm830_vm12 = vcmask 57344  }
 0x6f1   :  { %s1080_s2 = smov [#allocation8]  }
 0x6f2   :  { %s838_s10 = sshll.u32 %s1080_s2, 4  ;;  %s839_s10 = int_to_ptr.vmem [resolvable:$true] %s838_s10 }
 0x6f3   :  { %s1046_s11 = scalar_lea.vmem %s839_s10, 16  ;;  %s1050_s12 = scalar_lea.vmem %s839_s10, 32 }
 0x6f4   :  { %p1047_p13 = scmp.ne.s32.totalorder %s839_s10, %s1046_s11  ;;  %p1051_p0 = scmp.lt.s32.totalorder %s839_s10, %s839_s10 }
 0x6f5   :  { %p1052_p1 = scmp.lt.s32.totalorder %s1050_s12, %s1046_s11 }
 0x6f7   :  { %p1053_p2 = por %p1052_p1, %p1051_p0 }
 0x6f9   :  { %p1054_p3 = pnand %p1053_p2, %p1047_p13 }
 0x7bb   :  { %v826_v21 = vpop.f32.mrb[8].mxu0 }
 0x7bc   :  { %v827_v22 = vadd.f32 %v826_v21, %v753_v10  ;;  %v972_v23 = vpop.f32.mrb[9].mxu0 }
 0x7be   :  { %831 = vst.msk [vmem:[#allocation8] sm:$0x1] %vm830_vm12, %v827_v22 }
 0x7bf   :  { %1057 = shalt.err (!%p1054_p3)
}
 0x7c0   :  { %s1058_s5 = scalar_lea.hbm %s1275_s6, 16 }
 0x7c1   :  { %p1059_p4 = scmp.ne.s32.totalorder %s1275_s6, %s1058_s5  ;;  %p1062_p5 = scmp.lt.u32.totalorder %s1058_s5, %s1275_s6 }
 0x7c3   :  { %p1064_p6 = pnand %p1062_p5, %p1059_p4 }
 0x7c5   :  { %1067 = shalt.err (!%p1064_p6)
}
 0x7c6   :  { %841 = dma.vmem_to_hbm [thread:$0]  %s839_s10, 16, %s1275_s6, [#allocation6]  }
 0x7c7   :  { %1070 = dma.done.wait [#allocation6], 16  }
 0x7c8   :  { %1071 = vsyncadd [#allocation6], 4294967280 }
 0x7c9   :  { %1072 = dma.done.wait [#allocation10], 16  }
 0x7ca   :  { %1073 = vsyncadd [#allocation10], 4294967280 }
 0x7cb   :  { %858 = vsyncpa [#allocation6], 1 }
 0x7cc   :  { %859 = vsyncpa [#allocation10], 1 }
 0x7cd   :  { %860 = vsyncpa [#allocation7], 1 }

</bundles_post_ra>
